<compile_context>
chip_gen: v7x
topology: tpu7x:2x2x1
jax: 0.10.0
libtpu: 0.0.40
codegen_flags: <defaults>
</compile_context>

<pallas_src>
import functools

import jax
import jax.numpy as jnp
from jax.experimental import pallas as pl
from jax.experimental.pallas import tpu as pltpu


def _conv2dh_kernel(x_ref, w_ref, b_ref, o_ref, *, ks, OH, OW):
    # x_ref: (Hp, Wp, C)        padded NHWC input, one batch element
    # w_ref: (ks*ks*C, O_pad)   im2col weight, rows ordered (kh, kw, c)
    # b_ref: (1, O_pad)         bias (zero past O)
    # o_ref: (OH*OW, O_pad)     lane-dense output, one batch element
    #
    # Gather the ks*ks shifted views straight from the ref (static slices,
    # stride-2 along H implements the conv's H stride), concatenate them once
    # along the lane axis, and do ONE matmul on the MXU.
    taps = [
        x_ref[pl.ds(kh, OH, stride=2), pl.ds(kw, OW), :]   # (OH, OW, C)
        for kh in range(ks)
        for kw in range(ks)
    ]
    patches = jnp.concatenate(taps, axis=-1)               # (OH, OW, ks*ks*C)
    patches = patches.reshape(OH * OW, -1)                 # merge leading dims only
    acc = jnp.dot(patches, w_ref[...],
                  preferred_element_type=jnp.float32)      # (OH*OW, O_pad) f32
    o_ref[...] = acc + b_ref[...]


def conv2d_h(x_nchw, weight, bias, *, ks, ring_conv, compute_dtype=jnp.float32):
    """Forward pass of Conv2dH.

    x_nchw: (N, C, H, W); weight: (O, C, ks, ks); bias: (O,).
    compute_dtype: dtype fed to the MXU (jnp.bfloat16 halves HBM traffic on
    v6e/v5e; accumulation stays f32 either way). Default f32 for exactness.
    """
    N, C, H, W = x_nchw.shape
    O = weight.shape[0]
    assert ks % 2 == 1
    pad_h = ks // 2

    # --- glue: layout + padding (NCHW -> NHWC, channels on the lane axis) ---
    x = jnp.transpose(x_nchw, (0, 2, 3, 1))                        # (N, H, W, C)
    if ring_conv:
        # F.pad(x, (1, 1, 0, 0), mode='circular') pads only W by 1 each side.
        x = jnp.concatenate([x[:, :, -1:, :], x, x[:, :, :1, :]], axis=2)
        pad_w = 0
    else:
        pad_w = pad_h
    x = jnp.pad(x, ((0, 0), (pad_h, pad_h), (pad_w, pad_w), (0, 0)))
    x = x.astype(compute_dtype)
    Hp, Wp = x.shape[1], x.shape[2]
    OH = (Hp - ks) // 2 + 1          # stride 2 along H
    OW = Wp - ks + 1                 # stride 1 along W
    M = OH * OW
    # In-kernel tap reads stay in bounds: kh + 2*(OH-1) <= Hp-1, kw + OW-1 == Wp-1.
    assert ks - 1 + 2 * (OH - 1) <= Hp - 1 and OH >= 1 and OW >= 1

    # --- im2col weight: (O, C, ks, ks) -> (ks*ks*C, O), O padded lane-dense ---
    K = ks * ks * C
    O_pad = ((O + 127) // 128) * 128
    w = jnp.transpose(weight, (2, 3, 1, 0)).reshape(K, O)          # rows = (kh, kw, c)
    w = jnp.pad(w, ((0, 0), (0, O_pad - O))).astype(compute_dtype)
    b = jnp.pad(bias.reshape(1, O).astype(jnp.float32),
                ((0, 0), (0, O_pad - O)))

    kernel = functools.partial(_conv2dh_kernel, ks=ks, OH=OH, OW=OW)

    out = pl.pallas_call(
        kernel,
        out_shape=jax.ShapeDtypeStruct((N, M, O_pad), jnp.float32),
        grid=(N,),
        in_specs=[
            pl.BlockSpec((None, Hp, Wp, C), lambda n: (n, 0, 0, 0)),
            pl.BlockSpec((K, O_pad), lambda n: (0, 0)),
            pl.BlockSpec((1, O_pad), lambda n: (0, 0)),
        ],
        out_specs=pl.BlockSpec((None, M, O_pad), lambda n: (n, 0, 0)),
        compiler_params=pltpu.CompilerParams(
            dimension_semantics=("parallel",),
            vmem_limit_bytes=32 * 1024 * 1024,
        ),
    )(x, w, b)

    # --- glue: drop lane padding, back to NCHW ---
    out = out[:, :, :O].reshape(N, OH, OW, O)
    return jnp.transpose(out, (0, 3, 1, 2))


def _reference(x_nchw, weight, bias, *, ks, ring_conv):
    """Plain-JAX reference (matches PyTorch Conv2dH.forward)."""
    pad_h = ks // 2
    x = x_nchw
    if ring_conv:
        x = jnp.concatenate([x[..., -1:], x, x[..., :1]], axis=-1)
        pad_w = 0
    else:
        pad_w = pad_h
    out = jax.lax.conv_general_dilated(
        x, weight, window_strides=(2, 1),
        padding=((pad_h, pad_h), (pad_w, pad_w)),
        dimension_numbers=("NCHW", "OIHW", "NCHW"))
    return out + bias[None, :, None, None]


if __name__ == "__main__":
    # Small shapes consistent with the module: batch=2, in_c=4, out_c=8, 16x16 spatial.
    N, in_c, out_c, H, W, ks = 2, 4, 8, 16, 16, 3

    key = jax.random.PRNGKey(0)
    kx, kw, kb = jax.random.split(key, 3)
    x = jax.random.normal(kx, (N, in_c, H, W), dtype=jnp.float32)

    # Deterministic param init (PyTorch Conv2d-style uniform bound 1/sqrt(fan_in)).
    fan_in = in_c * ks * ks
    bound = 1.0 / (fan_in ** 0.5)
    weight = jax.random.uniform(kw, (out_c, in_c, ks, ks), jnp.float32, -bound, bound)
    bias = jax.random.uniform(kb, (out_c,), jnp.float32, -bound, bound)

    for ring_conv in (True, False):
        out = conv2d_h(x, weight, bias, ks=ks, ring_conv=ring_conv)
        out = jax.block_until_ready(out)
        ref = _reference(x, weight, bias, ks=ks, ring_conv=ring_conv)
        if out.shape != ref.shape or not jnp.allclose(out, ref, atol=1e-4, rtol=1e-4):
            raise AssertionError(
                f"mismatch (ring_conv={ring_conv}): "
                f"max abs err {float(jnp.max(jnp.abs(out - ref)))}")

    print("KERNEL_OK")
</pallas_src>

<mosaic_0001>
module attributes {stable_mosaic.version = 11 : i64} {
  func.func @_conv2dh_kernel(%arg0: i32, %arg1: memref<1x18x18x4xf32, #tpu.memory_space<vmem>>, %arg2: memref<36x128xf32, #tpu.memory_space<vmem>>, %arg3: memref<1x128xf32, #tpu.memory_space<vmem>>, %arg4: memref<1x128x128xf32, #tpu.memory_space<vmem>>) attributes {dimension_semantics = [#tpu.dimension_semantics<parallel>], iteration_bounds = array<i64: 2>, scalar_prefetch = 0 : i64, scratch_operands = 0 : i64, tpu.core_type = #tpu.core_type<tc>, window_params = [{transform_indices = @transform_0, window_bounds = array<i64: 1, 18, 18, 4>}, {pipeline_mode = #tpu.pipeline_mode<synchronous>, transform_indices = @transform_1, window_bounds = array<i64: 36, 128>}, {pipeline_mode = #tpu.pipeline_mode<synchronous>, transform_indices = @transform_2, window_bounds = array<i64: 1, 128>}, {transform_indices = @transform_3, window_bounds = array<i64: 1, 128, 128>}]} {
    %c0 = arith.constant 0 : index
    %c0_0 = arith.constant 0 : index
    %c0_1 = arith.constant 0 : index
    %c0_2 = arith.constant 0 : index
    %0 = tpu.strided_load %arg1[%c0, %c0_0, %c0_1, %c0_2] {strides = array<i32: 1, 2, 1, 1>} : memref<1x18x18x4xf32, #tpu.memory_space<vmem>>, vector<1x8x16x4xf32>
    %1 = vector.shape_cast %0 : vector<1x8x16x4xf32> to vector<8x16x4xf32>
    %c0_3 = arith.constant 0 : index
    %c0_4 = arith.constant 0 : index
    %c1 = arith.constant 1 : index
    %c0_5 = arith.constant 0 : index
    %2 = tpu.strided_load %arg1[%c0_3, %c0_4, %c1, %c0_5] {strides = array<i32: 1, 2, 1, 1>} : memref<1x18x18x4xf32, #tpu.memory_space<vmem>>, vector<1x8x16x4xf32>
    %3 = vector.shape_cast %2 : vector<1x8x16x4xf32> to vector<8x16x4xf32>
    %c0_6 = arith.constant 0 : index
    %c0_7 = arith.constant 0 : index
    %c2 = arith.constant 2 : index
    %c0_8 = arith.constant 0 : index
    %4 = tpu.strided_load %arg1[%c0_6, %c0_7, %c2, %c0_8] {strides = array<i32: 1, 2, 1, 1>} : memref<1x18x18x4xf32, #tpu.memory_space<vmem>>, vector<1x8x16x4xf32>
    %5 = vector.shape_cast %4 : vector<1x8x16x4xf32> to vector<8x16x4xf32>
    %c0_9 = arith.constant 0 : index
    %c1_10 = arith.constant 1 : index
    %c0_11 = arith.constant 0 : index
    %c0_12 = arith.constant 0 : index
    %6 = tpu.strided_load %arg1[%c0_9, %c1_10, %c0_11, %c0_12] {strides = array<i32: 1, 2, 1, 1>} : memref<1x18x18x4xf32, #tpu.memory_space<vmem>>, vector<1x8x16x4xf32>
    %7 = vector.shape_cast %6 : vector<1x8x16x4xf32> to vector<8x16x4xf32>
    %c0_13 = arith.constant 0 : index
    %c1_14 = arith.constant 1 : index
    %c1_15 = arith.constant 1 : index
    %c0_16 = arith.constant 0 : index
    %8 = tpu.strided_load %arg1[%c0_13, %c1_14, %c1_15, %c0_16] {strides = array<i32: 1, 2, 1, 1>} : memref<1x18x18x4xf32, #tpu.memory_space<vmem>>, vector<1x8x16x4xf32>
    %9 = vector.shape_cast %8 : vector<1x8x16x4xf32> to vector<8x16x4xf32>
    %c0_17 = arith.constant 0 : index
    %c1_18 = arith.constant 1 : index
    %c2_19 = arith.constant 2 : index
    %c0_20 = arith.constant 0 : index
    %10 = tpu.strided_load %arg1[%c0_17, %c1_18, %c2_19, %c0_20] {strides = array<i32: 1, 2, 1, 1>} : memref<1x18x18x4xf32, #tpu.memory_space<vmem>>, vector<1x8x16x4xf32>
    %11 = vector.shape_cast %10 : vector<1x8x16x4xf32> to vector<8x16x4xf32>
    %c0_21 = arith.constant 0 : index
    %c2_22 = arith.constant 2 : index
    %c0_23 = arith.constant 0 : index
    %c0_24 = arith.constant 0 : index
    %12 = tpu.strided_load %arg1[%c0_21, %c2_22, %c0_23, %c0_24] {strides = array<i32: 1, 2, 1, 1>} : memref<1x18x18x4xf32, #tpu.memory_space<vmem>>, vector<1x8x16x4xf32>
    %13 = vector.shape_cast %12 : vector<1x8x16x4xf32> to vector<8x16x4xf32>
    %c0_25 = arith.constant 0 : index
    %c2_26 = arith.constant 2 : index
    %c1_27 = arith.constant 1 : index
    %c0_28 = arith.constant 0 : index
    %14 = tpu.strided_load %arg1[%c0_25, %c2_26, %c1_27, %c0_28] {strides = array<i32: 1, 2, 1, 1>} : memref<1x18x18x4xf32, #tpu.memory_space<vmem>>, vector<1x8x16x4xf32>
    %15 = vector.shape_cast %14 : vector<1x8x16x4xf32> to vector<8x16x4xf32>
    %c0_29 = arith.constant 0 : index
    %c2_30 = arith.constant 2 : index
    %c2_31 = arith.constant 2 : index
    %c0_32 = arith.constant 0 : index
    %16 = tpu.strided_load %arg1[%c0_29, %c2_30, %c2_31, %c0_32] {strides = array<i32: 1, 2, 1, 1>} : memref<1x18x18x4xf32, #tpu.memory_space<vmem>>, vector<1x8x16x4xf32>
    %17 = vector.shape_cast %16 : vector<1x8x16x4xf32> to vector<8x16x4xf32>
    %18 = tpu.concatenate %1, %3, %5, %7, %9, %11, %13, %15, %17 in 2 : vector<8x16x4xf32>, vector<8x16x4xf32>, vector<8x16x4xf32>, vector<8x16x4xf32>, vector<8x16x4xf32>, vector<8x16x4xf32>, vector<8x16x4xf32>, vector<8x16x4xf32>, vector<8x16x4xf32> -> vector<8x16x36xf32>
    %19 = vector.shape_cast %18 : vector<8x16x36xf32> to vector<128x36xf32>
    %c0_33 = arith.constant 0 : index
    %c0_34 = arith.constant 0 : index
    %20 = vector.load %arg2[%c0_33, %c0_34] : memref<36x128xf32, #tpu.memory_space<vmem>>, vector<36x128xf32>
    %cst = arith.constant dense<0.000000e+00> : vector<128x128xf32>
    %21 = tpu.matmul %19, %20, %cst {dimension_numbers = #tpu.dot_dimension_numbers<[1], [0], [0], [1], [0, 0, 1, 1], [], []>} : vector<128x36xf32>, vector<36x128xf32>, vector<128x128xf32> -> vector<128x128xf32>
    %c0_35 = arith.constant 0 : index
    %c0_36 = arith.constant 0 : index
    %22 = vector.load %arg3[%c0_35, %c0_36] : memref<1x128xf32, #tpu.memory_space<vmem>>, vector<1x128xf32>
    %23 = vector.broadcast %22 : vector<1x128xf32> to vector<128x128xf32>
    %24 = arith.addf %21, %23 : vector<128x128xf32>
    %c0_37 = arith.constant 0 : index
    %c0_38 = arith.constant 0 : index
    %c0_39 = arith.constant 0 : index
    %25 = vector.load %arg4[%c0_37, %c0_38, %c0_39] : memref<1x128x128xf32, #tpu.memory_space<vmem>>, vector<1x128x128xf32>
    %26 = vector.shape_cast %25 : vector<1x128x128xf32> to vector<128x128xf32>
    %27 = vector.shape_cast %24 : vector<128x128xf32> to vector<1x128x128xf32>
    tpu.vector_store %arg4[%c0_37, %c0_38, %c0_39], %27 {strides = array<i32>} : memref<1x128x128xf32, #tpu.memory_space<vmem>>, vector<1x128x128xf32>,
    return
  }
  func.func @transform_0(%arg0: i32) -> (i32, i32, i32, i32) {
    %c0_i32 = arith.constant 0 : i32
    %c0_i32_0 = arith.constant 0 : i32
    %c0_i32_1 = arith.constant 0 : i32
    %c0_i32_2 = arith.constant 0 : i32
    return %arg0, %c0_i32, %c0_i32_0, %c0_i32_1 : i32, i32, i32, i32
  }
  func.func @transform_1(%arg0: i32) -> (i32, i32) {
    %c0_i32 = arith.constant 0 : i32
    %c0_i32_0 = arith.constant 0 : i32
    %c0_i32_1 = arith.constant 0 : i32
    return %c0_i32, %c0_i32_0 : i32, i32
  }
  func.func @transform_2(%arg0: i32) -> (i32, i32) {
    %c0_i32 = arith.constant 0 : i32
    %c0_i32_0 = arith.constant 0 : i32
    %c0_i32_1 = arith.constant 0 : i32
    return %c0_i32, %c0_i32_0 : i32, i32
  }
  func.func @transform_3(%arg0: i32) -> (i32, i32, i32) {
    %c0_i32 = arith.constant 0 : i32
    %c0_i32_0 = arith.constant 0 : i32
    %c0_i32_1 = arith.constant 0 : i32
    return %arg0, %c0_i32, %c0_i32_0 : i32, i32, i32
  }
}

</mosaic_0001>

<bundles_post_ra>
// kernel: tpu_custom_call.1
= control target key start
LH: loop header
LB: loop body
LE: loop exit
PB: predicated region body
PF: predicated region fallthrough
CT: control target
= control target key end

     0   :  { %8 = vsyncpa [#allocation3], 0  ;;  %s2366_s0 = inlined_call_operand.vmem [shape: f32[2,18,18,4], index: 0, kind: input, shape index: {}]   ;;  %s2367_s1 = inlined_call_operand.vmem [shape: f32[36,128], index: 1, kind: input, shape index: {}]   ;;  %s2368_s2 = inlined_call_operand.vmem [shape: f32[1,128], index: 2, kind: input, shape index: {}]   ;;  %s2369_s3 = inlined_call_operand.hbm [shape: f32[2,128,128], index: 3, kind: output, shape index: {}]  }
   0x1   :  { %10 = vsyncpa [#allocation3 + $0x1], 0  ;;  %s1603_s12 = smov 0   ;;  %s1605_s13 = smov 0  }
   0x2   :  { %s1607_s14 = smov 0   ;;  %s1609_s15 = smov 0  }
   0x3 LB: > { %s1624_s16 = sadd.s32 4294967295, %s1571_s15   ;;  %s1265_s17 = sadd.s32 4294967294, %s1571_s15   ;;  %s1571_s15 = sphi %s1609_s15, %s2393_s15   ;;  %s1567_s14 = sphi %s1607_s14, %s2392_s14   ;;  %s1563_s13 = sphi %s1605_s13, %s2391_s13   ;;  %s1559_s12 = sphi %s1603_s12, %s2390_s12  }
   0x4   : > { %s1628_s18 = sadd.s32 1, %s1571_s15   ;;  %s91_s19 = sadd.s32 1, %s1567_s14 }
   0x5   : > { %s88_s20 = ssub.s32 %s1571_s15, %s1628_s18  ;;  %p101_p0 = scmp.ne.s32.totalorder %s1567_s14, %s1563_s13 }
   0x6   : > { %p89_p1 = scmp.eq.s32.totalorder %s88_s20, 0  ;;  %p102_p2 = scmp.eq.s32.totalorder %s1624_s16, 1 }
   0x7   : > { %p107_p3 = scmp.ne.s32.totalorder %s1563_s13, %s1559_s12  ;;  %p108_p4 = scmp.eq.s32.totalorder %s1265_s17, 1 }
   0x8   : > { %s1639_s21 = scalar_select %p89_p1, %s1567_s14, %s91_s19  }
   0x9   : > { %p1641_p5 = por %p102_p2, %p101_p0  ;;  %p1645_p6 = por %p108_p4, %p107_p3 }
   0xa   : > { %p1268_p7 = scmp.ge.s32.totalorder %s1571_s15, 1  ;;  %p140_p8 = scmp.lt.s32.totalorder %s1571_s15, 3 }
   0xc   : > { %p141_p9 = pnand %p1268_p7, %p140_p8 }
   0xe   : > { %144 = sbr.rel (%p141_p9) target bundleno = 627 (0x273), region = 32 }
  0x15   : > { %p164_p10 = scmp.lt.s32.totalorder %s1624_s16, 1  ;;  %s1573_s29 = smov 4   ;;  %v963_v38 = vld [vmem:[%s2367_s1] sm:$0xff]  ;;  %v964_v39 = vld [vmem:[%s2367_s1 + $0x8] sm:$0xff]  ;;  %v965_v41 = vld [vmem:[%s2367_s1 + $0x10] sm:$0xff]  ;;  %vm1024_vm0 = vcmask 1043456  }
  0x16   : > { %s1574_s30 = smov 8   ;;  %s1575_s4 = smov 12   ;;  %v1446_v40 = vpack.c.bf16 %v964_v39, %v963_v38  ;;  %v966_v42 = vld [vmem:[%s2367_s1 + $0x18] sm:$0xff]  ;;  %v967_v44 = vld [vmem:[%s2367_s1 + $0x20] sm:$0xf]  ;;  %vm827_vm1 = vcmask 31744  }
  0x17   : > { %s165_s24 = scalar_select %p164_p10, %s1624_s16, 1  ;;  %v1450_v43 = vpack.c.bf16 %v966_v42, %v965_v41  ;;  %vm844_vm2 = vcmask 64512   ;;  %vm861_vm3 = vcmask 97280   ;;  %vm878_vm4 = vcmask 130048  }
  0x18   : > { %s1576_s5 = smov 16   ;;  %s1577_s6 = smov 20   ;;  %1447 = vmatprep.subr.bf16.mxu0 %v1446_v40  ;;  %1454 = vmatprep.subr.bf16.mxu1 %v1446_v40  ;;  %vm895_vm5 = vcmask 162816   ;;  %vm912_vm6 = vcmask 195584   ;;  %vm929_vm7 = vcmask 228352   ;;  %vm946_vm8 = vcmask 261120  }
  0x19   : > { %s1460_s25 = smul.u32 432, %s165_s24  ;;  %s1578_s7 = smov 24   ;;  %1449 = vmatpush3.bf16.msra.mxu0 %v1446_v40  ;;  %1457 = vmatpush3.bf16.msra.mxu1 %v1446_v40  ;;  %vm975_vm9 = vcmask 293888  }
  0x1a   : > { %s1579_s8 = smov 28   ;;  %1451 = vmatprep.subr.bf16.mxu0 %v1450_v43  ;;  %1455 = vmatprep.subr.bf16.mxu1 %v1450_v43  ;;  %s1580_s26 = smov 32  }
  0x1b   : > { %s1656_s28 = scalar_lea.vmem %s2366_s0, %s1460_s25  ;;  %s1581_s20 = smov [#allocation2]  }
  0x1c   : > { %v186_v0 = vld [vmem:[%s1656_s28 + $0x9] sm:$0xff]  ;;  %v185_v1 = vld [vmem:[%s1656_s28 + $0x1] sm:$0xff]  ;;  %v1279_v8 = vld [vmem:[%s1656_s28 + $0xd8] sm:$0xff]  ;;  %s1513_s24 = sshll.u32 %s1581_s20, 4  ;;  %s1514_s24 = int_to_ptr.vmem [resolvable:$false] %s1513_s24 }
  0x1d   : > { %333 = vrot.lane.b32.xlu1 %v186_v0, %s1573_s29  ;;  %331 = vrot.lane.b32.xlu0 %v185_v1, %s1573_s29  ;;  %v1663_v2 = vld [vmem:[%s1656_s28 + $0xc9] sm:$0xff]  ;;  %v1666_v3 = vld [vmem:[%s1656_s28 + $0xc1] sm:$0xff]  ;;  %s1515_s25 = scalar_lea.vmem %s1514_s24, 4096 }
  0x1e   : > { %2378 = vst [vmem:[#allocation5_spill] sm:$0xff] %v1663_v2  ;;  %2379 = vst [vmem:[#allocation6_spill] sm:$0xff] %v1666_v3  ;;  %v1673_v4 = vld [vmem:[%s1656_s28 + $0xc2] sm:$0xff]  ;;  %v1680_v6 = vld [vmem:[%s1656_s28 + $0xca] sm:$0xff]  ;;  %1453 = vmatpush3.bf16.msra.mxu0 %v1450_v43  ;;  %1458 = vmatpush3.bf16.msra.mxu1 %v1450_v43 }
  0x1f   : > { %2380 = vst [vmem:[#allocation7_spill] sm:$0xff] %v1673_v4  ;;  %v201_v5 = vld [vmem:[%s1656_s28 + $0x2] sm:$0xff]  ;;  %2381 = vst [vmem:[#allocation8_spill] sm:$0xff] %v1680_v6  ;;  %v202_v7 = vld [vmem:[%s1656_s28 + $0xa] sm:$0xff]  ;;  %1420 = vmatprep.subr.msk.mxu0 %vm1024_vm0, %v967_v44  ;;  %1456 = vmatprep.subr.msk.mxu1 %vm1024_vm0, %v967_v44 }
  0x20   : > { %v1271_v9 = vld [vmem:[%s1656_s28 + $0x18] sm:$0xff]  ;;  %v1280_v10 = vld [vmem:[%s1656_s28 + $0xe0] sm:$0xff]  ;;  %v1723_v26 = vld [vmem:[%s1656_s28 + $0xf0] sm:$0xff] }
  0x21   : > { %349 = vrot.lane.b32.xlu1 %v1663_v2, %s1573_s29  ;;  %347 = vrot.lane.b32.xlu0 %v1666_v3, %s1573_s29  ;;  %v1272_v11 = vld [vmem:[%s1656_s28 + $0x20] sm:$0xff]  ;;  %v195_v14 = vld [vmem:[%s1656_s28 + $0xf1] sm:$0xff] }
  0x22   : > { %v1295_v12 = vld [vmem:[%s1656_s28 + $0xd9] sm:$0xff]  ;;  %v187_v15 = vld [vmem:[%s1656_s28 + $0x31] sm:$0xff]  ;;  %v1296_v16 = vld [vmem:[%s1656_s28 + $0xe1] sm:$0xff]  ;;  %1421 = vmatpush3.msk.msra.mxu0 %vm1024_vm0, %v967_v44  ;;  %1459 = vmatpush3.msk.msra.mxu1 %vm1024_vm0, %v967_v44 }
  0x23   : > { %v1287_v13 = vld [vmem:[%s1656_s28 + $0x19] sm:$0xff]  ;;  %v1288_v17 = vld [vmem:[%s1656_s28 + $0x21] sm:$0xff]  ;;  %v1726_v27 = vld [vmem:[%s1656_s28 + $0x30] sm:$0xff] }
  0x24   : > { %v1311_v18 = vld [vmem:[%s1656_s28 + $0xda] sm:$0xff]  ;;  %v211_v22 = vld [vmem:[%s1656_s28 + $0xf2] sm:$0xff]  ;;  %v1312_v24 = vld [vmem:[%s1656_s28 + $0xe2] sm:$0xff] }
  0x25   : > { %411 = vrot.lane.b32.xlu1 %v1673_v4, %s1574_s30  ;;  %395 = vrot.lane.b32.xlu0 %v201_v5, %s1574_s30  ;;  %v1303_v19 = vld [vmem:[%s1656_s28 + $0x1a] sm:$0xff]  ;;  %v203_v23 = vld [vmem:[%s1656_s28 + $0x32] sm:$0xff] }
  0x26   : > { %v196_v20 = vld [vmem:[%s1656_s28 + $0xf9] sm:$0xff]  ;;  %v1304_v25 = vld [vmem:[%s1656_s28 + $0x22] sm:$0xff]  ;;  %v1282_v34 = vld [vmem:[%s1656_s28 + $0x110] sm:$0xff] }
  0x27   : > { %v188_v21 = vld [vmem:[%s1656_s28 + $0x39] sm:$0xff]  ;;  %v1281_v30 = vld [vmem:[%s1656_s28 + $0x108] sm:$0xff]  ;;  %v1274_v35 = vld [vmem:[%s1656_s28 + $0x50] sm:$0xff] }
  0x28   : > { %v212_v28 = vld [vmem:[%s1656_s28 + $0xfa] sm:$0xff]  ;;  %v1273_v31 = vld [vmem:[%s1656_s28 + $0x48] sm:$0xff]  ;;  %v1298_v47 = vld [vmem:[%s1656_s28 + $0x111] sm:$0xff] }
  0x29   : > { %413 = vrot.lane.b32.xlu1 %v1680_v6, %s1574_s30  ;;  %397 = vrot.lane.b32.xlu0 %v202_v7, %s1574_s30  ;;  %v204_v29 = vld [vmem:[%s1656_s28 + $0x3a] sm:$0xff]  ;;  %v1297_v36 = vld [vmem:[%s1656_s28 + $0x109] sm:$0xff] }
  0x2a   : > { %v1741_v32 = vld [vmem:[%s1656_s28 + $0xf8] sm:$0xff]  ;;  %v1289_v37 = vld [vmem:[%s1656_s28 + $0x49] sm:$0xff]  ;;  %v197_v45 = vld [vmem:[%s1656_s28 + $0x121] sm:$0xff] }
  0x2b   : > { %v1744_v33 = vld [vmem:[%s1656_s28 + $0x38] sm:$0xff]  ;;  %v189_v46 = vld [vmem:[%s1656_s28 + $0x61] sm:$0xff]  ;;  %v1313_v49 = vld [vmem:[%s1656_s28 + $0x10a] sm:$0xff] }
  0x2c   : > { %v1290_v48 = vld [vmem:[%s1656_s28 + $0x51] sm:$0xff]  ;;  %v198_v51 = vld [vmem:[%s1656_s28 + $0x129] sm:$0xff]  ;;  %v1806_v57 = vld [vmem:[%s1656_s28 + $0x120] sm:$0xff] }
  0x2d   : > { %475 = vrot.lane.b32.xlu1 %v1279_v8, %s1575_s4  ;;  %459 = vrot.lane.b32.xlu0 %v1271_v9, %s1575_s4  ;;  %v1305_v50 = vld [vmem:[%s1656_s28 + $0x4a] sm:$0xff]  ;;  %v213_v53 = vld [vmem:[%s1656_s28 + $0x122] sm:$0xff] }
  0x2e   : > { %v190_v52 = vld [vmem:[%s1656_s28 + $0x69] sm:$0xff]  ;;  %v1314_v55 = vld [vmem:[%s1656_s28 + $0x112] sm:$0xff]  ;;  %v1809_v58 = vld [vmem:[%s1656_s28 + $0x60] sm:$0xff] }
  0x2f   : > { %v205_v54 = vld [vmem:[%s1656_s28 + $0x62] sm:$0xff]  ;;  %v1306_v56 = vld [vmem:[%s1656_s28 + $0x52] sm:$0xff]  ;;  %v214_v61 = vld [vmem:[%s1656_s28 + $0x12a] sm:$0xff] }
  0x30   : > { %v206_v62 = vld [vmem:[%s1656_s28 + $0x6a] sm:$0xff]  ;;  %v1283_v1 = vld [vmem:[%s1656_s28 + $0x138] sm:$0xff] }
  0x31   : > { %477 = vrot.lane.b32.xlu1 %v1280_v10, %s1575_s4  ;;  %461 = vrot.lane.b32.xlu0 %v1272_v11, %s1575_s4  ;;  %v1275_v5 = vld [vmem:[%s1656_s28 + $0x78] sm:$0xff]  ;;  %v1836_v9 = vld [vmem:[%s1656_s28 + $0x128] sm:$0xff] }
  0x32   : > { %v1839_v10 = vld [vmem:[%s1656_s28 + $0x68] sm:$0xff]  ;;  %v1315_v39 = vld [vmem:[%s1656_s28 + $0x13a] sm:$0xff] }
  0x33   : > { %v1307_v40 = vld [vmem:[%s1656_s28 + $0x7a] sm:$0xff] }
  0x34   : > { %v1992_v2 = vld [vmem:[%s1656_s28 + $0x158] sm:$0xff] }
  0x35   : > { %539 = vrot.lane.b32.xlu1 %v1295_v12, %s1576_s5  ;;  %523 = vrot.lane.b32.xlu0 %v1287_v13, %s1576_s5  ;;  %v1995_v3 = vld [vmem:[%s1656_s28 + $0x98] sm:$0xff] }
  0x39   : > { %351 = vrot.lane.b32.xlu1 %v195_v14, %s1573_s29  ;;  %335 = vrot.lane.b32.xlu0 %v187_v15, %s1573_s29 }
  0x3d   : > { %541 = vrot.lane.b32.xlu1 %v1296_v16, %s1576_s5  ;;  %525 = vrot.lane.b32.xlu0 %v1288_v17, %s1576_s5  ;;  %v1276_v16 = vld [vmem:[%s1656_s28 + $0x80] sm:$0xff] }
  0x41   : > { %603 = vrot.lane.b32.xlu1 %v1311_v18, %s1577_s6  ;;  %587 = vrot.lane.b32.xlu0 %v1303_v19, %s1577_s6  ;;  %v1299_v19 = vld [vmem:[%s1656_s28 + $0x139] sm:$0xff] }
  0x45   : > { %353 = vrot.lane.b32.xlu1 %v196_v20, %s1573_s29  ;;  %337 = vrot.lane.b32.xlu0 %v188_v21, %s1573_s29 }
  0x49   : > { %415 = vrot.lane.b32.xlu1 %v211_v22, %s1574_s30  ;;  %399 = vrot.lane.b32.xlu0 %v203_v23, %s1574_s30 }
  0x4d   : > { %605 = vrot.lane.b32.xlu1 %v1312_v24, %s1577_s6  ;;  %589 = vrot.lane.b32.xlu0 %v1304_v25, %s1577_s6 }
  0x51   : > { %667 = vrot.lane.b32.xlu1 %v1723_v26, %s1578_s7  ;;  %651 = vrot.lane.b32.xlu0 %v1726_v27, %s1578_s7 }
  0x55   : > { %417 = vrot.lane.b32.xlu1 %v212_v28, %s1574_s30  ;;  %401 = vrot.lane.b32.xlu0 %v204_v29, %s1574_s30 }
  0x59   : > { %479 = vrot.lane.b32.xlu1 %v1281_v30, %s1575_s4  ;;  %463 = vrot.lane.b32.xlu0 %v1273_v31, %s1575_s4  ;;  %v1887_v30 = vld [vmem:[%s1656_s28 + $0x91] sm:$0xff] }
  0x5d   : > { %669 = vrot.lane.b32.xlu1 %v1741_v32, %s1578_s7  ;;  %653 = vrot.lane.b32.xlu0 %v1744_v33, %s1578_s7 }
  0x61   : > { %731 = vrot.lane.b32.xlu1 %v195_v14, %s1579_s8  ;;  %715 = vrot.lane.b32.xlu0 %v187_v15, %s1579_s8  ;;  %v1284_v15 = vld [vmem:[%s1656_s28 + $0x140] sm:$0xff] }
  0x65   : > { %481 = vrot.lane.b32.xlu1 %v1282_v34, %s1575_s4  ;;  %465 = vrot.lane.b32.xlu0 %v1274_v35, %s1575_s4  ;;  %v1300_v35 = vld [vmem:[%s1656_s28 + $0x141] sm:$0xff] }
  0x69   : > { %543 = vrot.lane.b32.xlu1 %v1297_v36, %s1576_s5  ;;  %527 = vrot.lane.b32.xlu0 %v1289_v37, %s1576_s5  ;;  %v1292_v36 = vld [vmem:[%s1656_s28 + $0x81] sm:$0xff] }
  0x6d   : > { %733 = vrot.lane.b32.xlu1 %v196_v20, %s1579_s8  ;;  %717 = vrot.lane.b32.xlu0 %v188_v21, %s1579_s8  ;;  %v1291_v20 = vld [vmem:[%s1656_s28 + $0x79] sm:$0xff] }
  0x71   : > { %795 = vrot.lane.b32.xlu1 %v211_v22, %s1580_s26  ;;  %779 = vrot.lane.b32.xlu0 %v203_v23, %s1580_s26 }
  0x75   : > { %355 = vrot.lane.b32.xlu1 %v197_v45, %s1573_s29  ;;  %339 = vrot.lane.b32.xlu0 %v189_v46, %s1573_s29 }
  0x79   : > { %545 = vrot.lane.b32.xlu1 %v1298_v47, %s1576_s5  ;;  %529 = vrot.lane.b32.xlu0 %v1290_v48, %s1576_s5 }
  0x7d   : > { %607 = vrot.lane.b32.xlu1 %v1313_v49, %s1577_s6  ;;  %591 = vrot.lane.b32.xlu0 %v1305_v50, %s1577_s6  ;;  %v1930_v49 = vld [vmem:[%s1656_s28 + $0x152] sm:$0xff] }
  0x7e   : > { %v1933_v50 = vld [vmem:[%s1656_s28 + $0x92] sm:$0xff] }
  0x81   : > { %797 = vrot.lane.b32.xlu1 %v212_v28, %s1580_s26  ;;  %781 = vrot.lane.b32.xlu0 %v204_v29, %s1580_s26  ;;  %v1884_v29 = vld [vmem:[%s1656_s28 + $0x151] sm:$0xff] }
  0x85   : > { %357 = vrot.lane.b32.xlu1 %v198_v51, %s1573_s29  ;;  %341 = vrot.lane.b32.xlu0 %v190_v52, %s1573_s29 }
  0x89   : > { %419 = vrot.lane.b32.xlu1 %v213_v53, %s1574_s30  ;;  %403 = vrot.lane.b32.xlu0 %v205_v54, %s1574_s30 }
  0x8d   : > { %609 = vrot.lane.b32.xlu1 %v1314_v55, %s1577_s6  ;;  %593 = vrot.lane.b32.xlu0 %v1306_v56, %s1577_s6 }
  0x8f   : > { %v1811_v59 = vpop.permute.xlu1 %333  ;;  %v1813_v60 = vpop.permute.xlu0 %331 }
  0x91   : > { %671 = vrot.lane.b32.xlu1 %v1806_v57, %s1578_s7  ;;  %655 = vrot.lane.b32.xlu0 %v1809_v58, %s1578_s7 }
  0x93   : > { %v1821_v63 = vpop.permute.xlu1 %349  ;;  %v1823_v0 = vpop.permute.xlu0 %347 }
  0x95   : > { %421 = vrot.lane.b32.xlu1 %v214_v61, %s1574_s30  ;;  %405 = vrot.lane.b32.xlu0 %v206_v62, %s1574_s30 }
  0x97   : > { %v1829_v7 = vpop.permute.xlu1 %411  ;;  %v1831_v8 = vpop.permute.xlu0 %395 }
  0x99   : > { %483 = vrot.lane.b32.xlu1 %v1283_v1, %s1575_s4  ;;  %467 = vrot.lane.b32.xlu0 %v1275_v5, %s1575_s4 }
  0x9b   : > { %v1841_v11 = vpop.permute.xlu1 %413  ;;  %v1843_v12 = vpop.permute.xlu0 %397 }
  0x9d   : > { %673 = vrot.lane.b32.xlu1 %v1836_v9, %s1578_s7  ;;  %657 = vrot.lane.b32.xlu0 %v1839_v10, %s1578_s7 }
  0x9f   : > { %v1849_v13 = vpop.permute.xlu1 %475  ;;  %v1851_v14 = vpop.permute.xlu0 %459 }
  0xa1   : > { %735 = vrot.lane.b32.xlu1 %v197_v45, %s1579_s8  ;;  %719 = vrot.lane.b32.xlu0 %v189_v46, %s1579_s8  ;;  %v1916_v45 = vld [vmem:[%s1656_s28 + $0x159] sm:$0xff] }
  0xa2   : > { %v1919_v46 = vld [vmem:[%s1656_s28 + $0x99] sm:$0xff] }
  0xa3   : > { %v1857_v17 = vpop.permute.xlu1 %477  ;;  %v1859_v18 = vpop.permute.xlu0 %461 }
  0xa5   : > { %485 = vrot.lane.b32.xlu1 %v1284_v15, %s1575_s4  ;;  %469 = vrot.lane.b32.xlu0 %v1276_v16, %s1575_s4  ;;  %v1962_v15 = vld [vmem:[%s1656_s28 + $0x15a] sm:$0xff] }
  0xa6   : > { %v1965_v16 = vld [vmem:[%s1656_s28 + $0x9a] sm:$0xff] }
  0xa7   : > { %v1865_v21 = vpop.permute.xlu1 %539  ;;  %v1867_v22 = vpop.permute.xlu0 %523 }
  0xa9   : > { %547 = vrot.lane.b32.xlu1 %v1299_v19, %s1576_s5  ;;  %531 = vrot.lane.b32.xlu0 %v1291_v20, %s1576_s5 }
  0xab   : > { %v1871_v23 = vpop.permute.xlu1 %351  ;;  %v1873_v24 = vpop.permute.xlu0 %335 }
  0xad   : > { %737 = vrot.lane.b32.xlu1 %v198_v51, %s1579_s8  ;;  %721 = vrot.lane.b32.xlu0 %v190_v52, %s1579_s8 }
  0xaf   : > { %v1877_v25 = vpop.permute.xlu1 %541  ;;  %v1879_v28 = vpop.permute.xlu0 %525 }
  0xb1   : > { %799 = vrot.lane.b32.xlu1 %v213_v53, %s1580_s26  ;;  %783 = vrot.lane.b32.xlu0 %v205_v54, %s1580_s26  ;;  %v1316_v53 = vld [vmem:[%s1656_s28 + $0x142] sm:$0xff] }
  0xb2   : > { %v1308_v54 = vld [vmem:[%s1656_s28 + $0x82] sm:$0xff] }
  0xb3   : > { %v1889_v31 = vpop.permute.xlu1 %603  ;;  %v1891_v34 = vpop.permute.xlu0 %587 }
  0xb5   : > { %359 = vrot.lane.b32.xlu1 %v1884_v29, %s1573_s29  ;;  %343 = vrot.lane.b32.xlu0 %v1887_v30, %s1573_s29 }
  0xb7   : > { %v1899_v37 = vpop.permute.xlu1 %353  ;;  %v1901_v38 = vpop.permute.xlu0 %337 }
  0xb9   : > { %549 = vrot.lane.b32.xlu1 %v1300_v35, %s1576_s5  ;;  %533 = vrot.lane.b32.xlu0 %v1292_v36, %s1576_s5  ;;  %v1285_v35 = vld [vmem:[%s1656_s28 + $0x168] sm:$0xff] }
  0xba   : > { %v1277_v36 = vld [vmem:[%s1656_s28 + $0xa8] sm:$0xff] }
  0xbb   : > { %v416_v41 = vpop.permute.xlu1 %415  ;;  %v400_v42 = vpop.permute.xlu0 %399 }
  0xbd   : > { %611 = vrot.lane.b32.xlu1 %v1315_v39, %s1577_s6  ;;  %595 = vrot.lane.b32.xlu0 %v1307_v40, %s1577_s6 }
  0xbf   : > { %v1909_v43 = vpop.permute.xlu1 %605  ;;  %v1911_v44 = vpop.permute.xlu0 %589 }
  0xc1   : > { %801 = vrot.lane.b32.xlu1 %v214_v61, %s1580_s26  ;;  %785 = vrot.lane.b32.xlu0 %v206_v62, %s1580_s26  ;;  %v1948_v61 = vld [vmem:[%s1656_s28 + $0x150] sm:$0xff] }
  0xc2   : > { %2382 = vst [vmem:[#allocation9_spill] sm:$0xff] %v1948_v61  ;;  %v1951_v62 = vld [vmem:[%s1656_s28 + $0x90] sm:$0xff] }
  0xc3   : > { %v1921_v47 = vpop.permute.xlu1 %667  ;;  %v1923_v48 = vpop.permute.xlu0 %651  ;;  %2383 = vst [vmem:[#allocation10_spill] sm:$0xff] %v1951_v62 }
  0xc5   : > { %361 = vrot.lane.b32.xlu1 %v1916_v45, %s1573_s29  ;;  %345 = vrot.lane.b32.xlu0 %v1919_v46, %s1573_s29 }
  0xc7   : > { %v1935_v51 = vpop.permute.xlu1 %417  ;;  %v1937_v52 = vpop.permute.xlu0 %401 }
  0xc9   : > { %423 = vrot.lane.b32.xlu1 %v1930_v49, %s1574_s30  ;;  %407 = vrot.lane.b32.xlu0 %v1933_v50, %s1574_s30 }
  0xcb   : > { %v480_v55 = vpop.permute.xlu1 %479  ;;  %v464_v56 = vpop.permute.xlu0 %463 }
  0xcd   : > { %613 = vrot.lane.b32.xlu1 %v1316_v53, %s1577_s6  ;;  %597 = vrot.lane.b32.xlu0 %v1308_v54, %s1577_s6  ;;  %v169_v53 = vld [vmem:[%s1656_s28] sm:$0xff]  ;;  %v838_v54 = vsel %vm827_vm1, %v1723_v26, %v1871_v23 }
  0xce   : > { %v855_v6 = vsel %vm844_vm2, %v838_v54, %v416_v41  ;;  %v828_v41 = vsel %vm827_vm1, %v169_v53, %v1813_v60 }
  0xcf   : > { %v1953_v1 = vpop.permute.xlu1 %669  ;;  %v1955_v5 = vpop.permute.xlu0 %653  ;;  %v872_v26 = vsel %vm861_vm3, %v855_v6, %v480_v55  ;;  %v845_v6 = vsel %vm844_vm2, %v828_v41, %v1831_v8  ;;  %v2064_v41 = vld [vmem:[%s1656_s28 + $0xc8] sm:$0xff] }
  0xd1   : > { %675 = vrot.lane.b32.xlu1 %v1948_v61, %s1578_s7  ;;  %659 = vrot.lane.b32.xlu0 %v1951_v62, %s1578_s7  ;;  %v830_v62 = vsel %vm827_vm1, %v1726_v27, %v1873_v24  ;;  %v1987_v61 = vld [vmem:[%s1656_s28 + $0xc0] sm:$0xff] }
  0xd2   : > { %v847_v4 = vsel %vm844_vm2, %v830_v62, %v400_v42  ;;  %v836_v42 = vsel %vm827_vm1, %v1987_v61, %v1823_v0  ;;  %v862_v0 = vsel %vm861_vm3, %v845_v6, %v1851_v14 }
  0xd3   : > { %v732_v19 = vpop.permute.xlu1 %731  ;;  %v716_v20 = vpop.permute.xlu0 %715  ;;  %v864_v27 = vsel %vm861_vm3, %v847_v4, %v464_v56  ;;  %v853_v4 = vsel %vm844_vm2, %v836_v42, %v1829_v7  ;;  %v879_v8 = vsel %vm878_vm4, %v862_v0, %v1867_v22  ;;  %v1286_v22 = vld [vmem:[%s1656_s28 + $0x170] sm:$0xff] }
  0xd4   : > { %v870_v60 = vsel %vm861_vm3, %v853_v4, %v1849_v13  ;;  %v896_v13 = vsel %vm895_vm5, %v879_v8, %v1891_v34 }
  0xd5   : > { %425 = vrot.lane.b32.xlu1 %v1962_v15, %s1574_s30  ;;  %409 = vrot.lane.b32.xlu0 %v1965_v16, %s1574_s30  ;;  %v887_v7 = vsel %vm878_vm4, %v870_v60, %v1865_v21  ;;  %v913_v21 = vsel %vm912_vm6, %v896_v13, %v1923_v48  ;;  %v1293_v48 = vld [vmem:[%s1656_s28 + $0xa9] sm:$0xff] }
  0xd6   : > { %v904_v62 = vsel %vm895_vm5, %v887_v7, %v1889_v31  ;;  %v1278_v31 = vld [vmem:[%s1656_s28 + $0xb0] sm:$0xff]  ;;  %v930_v34 = vsel %vm929_vm7, %v913_v21, %v716_v20 }
  0xd7   : > { %v1973_v39 = vpop.permute.xlu1 %481  ;;  %v1975_v40 = vpop.permute.xlu0 %465  ;;  %v921_v14 = vsel %vm912_vm6, %v904_v62, %v1921_v47  ;;  %v1301_v47 = vld [vmem:[%s1656_s28 + $0x169] sm:$0xff] }
  0xd8   : > { %v938_v53 = vsel %vm929_vm7, %v921_v14, %v732_v19 }
  0xd9   : > { %487 = vrot.lane.b32.xlu1 %v1285_v35, %s1575_s4  ;;  %471 = vrot.lane.b32.xlu0 %v1277_v36, %s1575_s4 }
  0xdb   : > { %v544_v23 = vpop.permute.xlu1 %543  ;;  %v528_v24 = vpop.permute.xlu0 %527 }
  0xdc   : > { %v2000_v35 = vsel %vm878_vm4, %v872_v26, %v544_v23  ;;  %v2003_v36 = vsel %vm878_vm4, %v864_v27, %v528_v24  ;;  %v839_v27 = vsel %vm827_vm1, %v1741_v32, %v1899_v37  ;;  %v831_v23 = vsel %vm827_vm1, %v1744_v33, %v1901_v38  ;;  %v170_v24 = vld [vmem:[%s1656_s28 + $0x8] sm:$0xff] }
  0xdd   : > { %677 = vrot.lane.b32.xlu1 %v1992_v2, %s1578_s7  ;;  %661 = vrot.lane.b32.xlu0 %v1995_v3, %s1578_s7  ;;  %v856_v42 = vsel %vm844_vm2, %v839_v27, %v1935_v51  ;;  %v848_v4 = vsel %vm844_vm2, %v831_v23, %v1937_v52  ;;  %v829_v51 = vsel %vm827_vm1, %v170_v24, %v1811_v59 }
  0xde   : > { %v873_v32 = vsel %vm861_vm3, %v856_v42, %v1973_v39  ;;  %v865_v37 = vsel %vm861_vm3, %v848_v4, %v1975_v40  ;;  %v837_v52 = vsel %vm827_vm1, %v2064_v41, %v1821_v63  ;;  %v846_v40 = vsel %vm844_vm2, %v829_v51, %v1843_v12  ;;  %v2384_v42 = vld [vmem:[#allocation6_spill] sm:$0xff] }
  0xdf   : > { %v2022_v55 = vpop.permute.xlu1 %733  ;;  %v2024_v56 = vpop.permute.xlu0 %717  ;;  %v854_v39 = vsel %vm844_vm2, %v837_v52, %v1841_v11  ;;  %v863_v63 = vsel %vm861_vm3, %v846_v40, %v1859_v18  ;;  %v1350_v4 = vld [vmem:[%s1656_s28 + $0x189] sm:$0xff] }
  0xe0   : > { %v871_v59 = vsel %vm861_vm3, %v854_v39, %v1857_v17  ;;  %v880_v7 = vsel %vm878_vm4, %v863_v63, %v1879_v28  ;;  %v1294_v28 = vld [vmem:[%s1656_s28 + $0xb1] sm:$0xff] }
  0xe1   : > { %739 = vrot.lane.b32.xlu1 %v1884_v29, %s1579_s8  ;;  %723 = vrot.lane.b32.xlu0 %v1887_v30, %s1579_s8  ;;  %v897_v12 = vsel %vm895_vm5, %v880_v7, %v1911_v44  ;;  %v2386_v52 = vld [vmem:[#allocation7_spill] sm:$0xff]  ;;  %v2387_v7 = vld [vmem:[#allocation8_spill] sm:$0xff] }
  0xe2   : > { %v914_v18 = vsel %vm912_vm6, %v897_v12, %v1955_v5  ;;  %v1309_v5 = vld [vmem:[%s1656_s28 + $0xaa] sm:$0xff] }
  0xe3   : > { %v796_v54 = vpop.permute.xlu1 %795  ;;  %v780_v29 = vpop.permute.xlu0 %779  ;;  %v931_v44 = vsel %vm929_vm7, %v914_v18, %v2024_v56  ;;  %v1366_v39 = vld [vmem:[%s1656_s28 + $0x18a] sm:$0xff] }
  0xe4   : > { %v947_v30 = vsel %vm946_vm8, %v930_v34, %v780_v29  ;;  %v955_v26 = vsel %vm946_vm8, %v938_v53, %v796_v54  ;;  %v1318_v34 = vld [vmem:[%s1656_s28 + $0x172] sm:$0xff] }
  0xe5   : > { %489 = vrot.lane.b32.xlu1 %v1286_v22, %s1575_s4  ;;  %473 = vrot.lane.b32.xlu0 %v1278_v31, %s1575_s4  ;;  %v1310_v54 = vld [vmem:[%s1656_s28 + $0xb2] sm:$0xff] }
  0xe6   : > { %1422 = vmatprep.mubr.msk.f32.mxu0 %vm975_vm9, %v947_v30  ;;  %1434 = vmatprep.mubr.msk.f32.mxu1 %vm975_vm9, %v955_v26 }
  0xe7   : > { %v356_v19 = vpop.permute.xlu1 %355  ;;  %v340_v20 = vpop.permute.xlu0 %339 }
  0xe8   : > { %v840_v13 = vsel %vm827_vm1, %v1806_v57, %v356_v19  ;;  %v832_v14 = vsel %vm827_vm1, %v1809_v58, %v340_v20  ;;  %v1333_v58 = vld [vmem:[%s1656_s28 + $0x180] sm:$0xff] }
  0xe9   : > { %551 = vrot.lane.b32.xlu1 %v1301_v47, %s1576_s5  ;;  %535 = vrot.lane.b32.xlu0 %v1293_v48, %s1576_s5 }
  0xeb   : > { %v546_v33 = vpop.permute.xlu1 %545  ;;  %v530_v38 = vpop.permute.xlu0 %529 }
  0xec   : > { %v2075_v6 = vsel %vm878_vm4, %v873_v32, %v546_v33  ;;  %v2078_v60 = vsel %vm878_vm4, %v865_v37, %v530_v38  ;;  %v1365_v33 = vld [vmem:[%s1656_s28 + $0x182] sm:$0xff] }
  0xed   : > { %741 = vrot.lane.b32.xlu1 %v1916_v45, %s1579_s8  ;;  %725 = vrot.lane.b32.xlu0 %v1919_v46, %s1579_s8  ;;  %v888_v46 = vsel %vm878_vm4, %v871_v59, %v1877_v25  ;;  %v1302_v25 = vld [vmem:[%s1656_s28 + $0x171] sm:$0xff] }
  0xee   : > { %v905_v11 = vsel %vm895_vm5, %v888_v46, %v1909_v43 }
  0xef   : > { %v2097_v0 = vpop.permute.xlu1 %607  ;;  %v2099_v45 = vpop.permute.xlu0 %591  ;;  %v922_v17 = vsel %vm912_vm6, %v905_v11, %v1953_v1  ;;  %v1317_v1 = vld [vmem:[%s1656_s28 + $0x16a] sm:$0xff] }
  0xf0   : > { %v939_v43 = vsel %vm929_vm7, %v922_v17, %v2022_v55 }
  0xf1   : > { %803 = vrot.lane.b32.xlu1 %v1930_v49, %s1580_s26  ;;  %787 = vrot.lane.b32.xlu0 %v1933_v50, %s1580_s26 }
  0xf3   : > { %v798_v49 = vpop.permute.xlu1 %797  ;;  %v782_v8 = vpop.permute.xlu0 %781 }
  0xf4   : > { %v956_v62 = vsel %vm946_vm8, %v939_v43, %v798_v49  ;;  %v948_v50 = vsel %vm946_vm8, %v931_v44, %v782_v8  ;;  %v906_v43 = vsel %vm895_vm5, %v2000_v35, %v2097_v0  ;;  %v898_v44 = vsel %vm895_vm5, %v2003_v36, %v2099_v45 }
  0xf5   : > { %553 = vrot.lane.b32.xlu1 %v1302_v25, %s1576_s5  ;;  %537 = vrot.lane.b32.xlu0 %v1294_v28, %s1576_s5 }
  0xf6   : > { %1423 = vmatmul.mubr.msk.f32.vlgmr.msra.gmra.mrb[0].mxu0 %vm975_vm9, %v948_v50  ;;  %1435 = vmatmul.mubr.msk.f32.vlgmr.msra.gmra.mrb[0].mxu1 %vm975_vm9, %v956_v62 }
  0xf7   : > { %v358_v55 = vpop.permute.xlu1 %357  ;;  %v342_v56 = vpop.permute.xlu0 %341 }
  0xf8   : > { %v833_v47 = vsel %vm827_vm1, %v1839_v10, %v342_v56 }
  0xf9   : > { %615 = vrot.lane.b32.xlu1 %v1317_v1, %s1577_s6  ;;  %599 = vrot.lane.b32.xlu0 %v1309_v5, %s1577_s6 }
  0xfb   : > { %v420_v21 = vpop.permute.xlu1 %419  ;;  %v404_v22 = vpop.permute.xlu0 %403 }
  0xfc   : > { %v857_v31 = vsel %vm844_vm2, %v840_v13, %v420_v21  ;;  %v849_v53 = vsel %vm844_vm2, %v832_v14, %v404_v22 }
  0xfd   : > { %805 = vrot.lane.b32.xlu1 %v1962_v15, %s1580_s26  ;;  %789 = vrot.lane.b32.xlu0 %v1965_v16, %s1580_s26  ;;  %v1334_v15 = vld [vmem:[%s1656_s28 + $0x188] sm:$0xff]  ;;  %v841_v16 = vsel %vm827_vm1, %v1836_v9, %v358_v55 }
  0xff   : > { %v2145_v29 = vpop.permute.xlu1 %609  ;;  %v2147_v57 = vpop.permute.xlu0 %593 }
 0x101   : > { %617 = vrot.lane.b32.xlu1 %v1318_v34, %s1577_s6  ;;  %601 = vrot.lane.b32.xlu0 %v1310_v54, %s1577_s6 }
 0x103   : > { %v672_v30 = vpop.permute.xlu1 %671  ;;  %v656_v26 = vpop.permute.xlu0 %655 }
 0x104   : > { %v923_v49 = vsel %vm912_vm6, %v906_v43, %v672_v30  ;;  %v915_v8 = vsel %vm912_vm6, %v898_v44, %v656_v26 }
 0x105   : > { %679 = vrot.lane.b32.xlu1 %v1333_v58, %s1578_s7  ;;  %663 = vrot.lane.b32.xlu0 %v1987_v61, %s1578_s7  ;;  %v1349_v61 = vld [vmem:[%s1656_s28 + $0x181] sm:$0xff]  ;;  %s161_s28 = sand.u32 1, %s1563_s13  }
 0x106   : > { %s1269_s29 = sshll.u32 %s161_s28, 7 }
 0x107   : > { %v422_v48 = vpop.permute.xlu1 %421  ;;  %v406_v19 = vpop.permute.xlu0 %405  ;;  %s2295_s6 = scalar_lea.vmem [#allocation2], %s1269_s29 }
 0x108   : > { %v858_v20 = vsel %vm844_vm2, %v841_v16, %v422_v48  ;;  %v850_v27 = vsel %vm844_vm2, %v833_v47, %v406_v19  ;;  %v2389_v48 = vld [vmem:[#allocation10_spill] sm:$0xff] }
 0x109   : > { %681 = vrot.lane.b32.xlu1 %v1334_v15, %s1578_s7  ;;  %665 = vrot.lane.b32.xlu0 %v2064_v41, %s1578_s7  ;;  %v2385_v41 = vld [vmem:[#allocation5_spill] sm:$0xff]  ;;  %s1390_s7 = sshll.u32 %s1624_s16, 11  ;;  %s2324_s16 = scalar_lea.sflag [#allocation3], %s161_s28 }
 0x10a   : > { %s2314_s17 = scalar_lea.hbm %s2369_s3, %s1390_s7 }
 0x10b   : > { %v484_v23 = vpop.permute.xlu1 %483  ;;  %v468_v24 = vpop.permute.xlu0 %467 }
 0x10c   : > { %v874_v9 = vsel %vm861_vm3, %v857_v31, %v484_v23  ;;  %v866_v10 = vsel %vm861_vm3, %v849_v53, %v468_v24  ;;  %v907_v31 = vsel %vm895_vm5, %v2075_v6, %v2145_v29  ;;  %v899_v53 = vsel %vm895_vm5, %v2078_v60, %v2147_v57  ;;  %v2388_v29 = vld [vmem:[#allocation9_spill] sm:$0xff] }
 0x10d   : > { %743 = vrot.lane.b32.xlu1 %v1349_v61, %s1579_s8  ;;  %727 = vrot.lane.b32.xlu0 %v2384_v42, %s1579_s8 }
 0x10f   : > { %v674_v32 = vpop.permute.xlu1 %673  ;;  %v658_v37 = vpop.permute.xlu0 %657 }
 0x110   : > { %v924_v34 = vsel %vm912_vm6, %v907_v31, %v674_v32  ;;  %v916_v54 = vsel %vm912_vm6, %v899_v53, %v658_v37 }
 0x111   : > { %745 = vrot.lane.b32.xlu1 %v1350_v4, %s1579_s8  ;;  %729 = vrot.lane.b32.xlu0 %v2385_v41, %s1579_s8  ;;  %s1203_s8 = sshll.u32 %s2295_s6, 4  ;;  %s2316_s8 = int_to_ptr.vmem [resolvable:$true] %s1203_s8 }
 0x112   : > { %s1509_s19 = scalar_lea.vmem %s2316_s8, 2048  ;;  %p1516_p0 = scmp.lt.s32.totalorder %s2316_s8, %s1514_s24 }
 0x113   : > { %v736_v38 = vpop.permute.xlu1 %735  ;;  %v720_v51 = vpop.permute.xlu0 %719  ;;  %p1510_p11 = scmp.ne.s32.totalorder %s2316_s8, %s1509_s19  ;;  %p1517_p1 = scmp.lt.s32.totalorder %s1515_s25, %s1509_s19 }
 0x114   : > { %v940_v62 = vsel %vm929_vm7, %v923_v49, %v736_v38  ;;  %v932_v50 = vsel %vm929_vm7, %v915_v8, %v720_v51 }
 0x115   : > { %807 = vrot.lane.b32.xlu1 %v1365_v33, %s1580_s26  ;;  %791 = vrot.lane.b32.xlu0 %v2386_v52, %s1580_s26  ;;  %p1511_p12 = pnand %p1510_p11, %p1641_p5  ;;  %p1518_p2 = por %p1517_p1, %p1516_p0 }
 0x117   : > { %v486_v40 = vpop.permute.xlu1 %485  ;;  %v470_v59 = vpop.permute.xlu0 %469  ;;  %p1512_p13 = pneg %p1511_p12 }
 0x118   : > { %v875_v63 = vsel %vm861_vm3, %v858_v20, %v486_v40  ;;  %v867_v46 = vsel %vm861_vm3, %v850_v27, %v470_v59 }
 0x119   : > { %809 = vrot.lane.b32.xlu1 %v1366_v39, %s1580_s26  ;;  %793 = vrot.lane.b32.xlu0 %v2387_v7, %s1580_s26  ;;  %p1519_p3 = pnand %p1518_p2, %p1512_p13 }
 0x11b   : > { %v548_v11 = vpop.permute.xlu1 %547  ;;  %v532_v12 = vpop.permute.xlu0 %531 }
 0x11c   : > { %v2186_v17 = vsel %vm878_vm4, %v874_v9, %v548_v11  ;;  %v2189_v18 = vsel %vm878_vm4, %v866_v10, %v532_v12 }
 0x11f   : > { %v738_v25 = vpop.permute.xlu1 %737  ;;  %v722_v28 = vpop.permute.xlu0 %721 }
 0x120   : > { %v941_v58 = vsel %vm929_vm7, %v924_v34, %v738_v25  ;;  %v933_v30 = vsel %vm929_vm7, %v916_v54, %v722_v28 }
 0x123   : > { %v800_v1 = vpop.permute.xlu1 %799  ;;  %v784_v5 = vpop.permute.xlu0 %783 }
 0x124   : > { %v957_v55 = vsel %vm946_vm8, %v940_v62, %v800_v1  ;;  %v949_v56 = vsel %vm946_vm8, %v932_v50, %v784_v5 }
 0x125   : > { %1425 = vmatprep.mubr.msk.f32.mxu0 %vm975_vm9, %v949_v56  ;;  %1437 = vmatprep.mubr.msk.f32.mxu1 %vm975_vm9, %v957_v55 }
 0x127   : > { %v360_v35 = vpop.permute.xlu1 %359  ;;  %v344_v36 = vpop.permute.xlu0 %343 }
 0x128   : > { %v842_v57 = vsel %vm827_vm1, %v2388_v29, %v360_v35  ;;  %v834_v19 = vsel %vm827_vm1, %v2389_v48, %v344_v36 }
 0x12b   : > { %v550_v0 = vpop.permute.xlu1 %549  ;;  %v534_v45 = vpop.permute.xlu0 %533 }
 0x12c   : > { %v892_v13 = vsel %vm878_vm4, %v875_v63, %v550_v0  ;;  %v884_v14 = vsel %vm878_vm4, %v867_v46, %v534_v45 }
 0x12f   : > { %v612_v21 = vpop.permute.xlu1 %611  ;;  %v596_v22 = vpop.permute.xlu0 %595 }
 0x130   : > { %v908_v11 = vsel %vm895_vm5, %v2186_v17, %v612_v21  ;;  %v900_v12 = vsel %vm895_vm5, %v2189_v18, %v596_v22 }
 0x133   : > { %v802_v26 = vpop.permute.xlu1 %801  ;;  %v786_v15 = vpop.permute.xlu0 %785 }
 0x134   : > { %v958_v16 = vsel %vm946_vm8, %v941_v58, %v802_v26  ;;  %v950_v47 = vsel %vm946_vm8, %v933_v30, %v786_v15 }
 0x135   : > { %1426 = vmatmul.mubr.msk.f32.gmra.mrb[2].mxu0 %vm975_vm9, %v950_v47  ;;  %1438 = vmatmul.mubr.msk.f32.gmra.mrb[2].mxu1 %vm975_vm9, %v958_v16 }
 0x137   : > { %v2221_v6 = vpop.permute.xlu1 %361  ;;  %v2223_v60 = vpop.permute.xlu0 %345 }
 0x13b   : > { %v424_v20 = vpop.permute.xlu1 %423  ;;  %v408_v27 = vpop.permute.xlu0 %407 }
 0x13c   : > { %v859_v61 = vsel %vm844_vm2, %v842_v57, %v424_v20  ;;  %v851_v23 = vsel %vm844_vm2, %v834_v19, %v408_v27  ;;  %v843_v20 = vsel %vm827_vm1, %v1992_v2, %v2221_v6  ;;  %v835_v27 = vsel %vm827_vm1, %v1995_v3, %v2223_v60 }
 0x13f   : > { %v614_v24 = vpop.permute.xlu1 %613  ;;  %v598_v9 = vpop.permute.xlu0 %597 }
 0x140   : > { %v909_v55 = vsel %vm895_vm5, %v892_v13, %v614_v24  ;;  %v901_v56 = vsel %vm895_vm5, %v884_v14, %v598_v9 }
 0x143   : > { %v676_v10 = vpop.permute.xlu1 %675  ;;  %v660_v42 = vpop.permute.xlu0 %659 }
 0x144   : > { %v925_v25 = vsel %vm912_vm6, %v908_v11, %v676_v10  ;;  %v917_v28 = vsel %vm912_vm6, %v900_v12, %v660_v42 }
 0x147   : > { %v426_v4 = vpop.permute.xlu1 %425  ;;  %v410_v32 = vpop.permute.xlu0 %409 }
 0x148   : > { %v852_v9 = vsel %vm844_vm2, %v835_v27, %v410_v32 }
 0x14b   : > { %v488_v37 = vpop.permute.xlu1 %487  ;;  %v472_v41 = vpop.permute.xlu0 %471 }
 0x14c   : > { %v876_v16 = vsel %vm861_vm3, %v859_v61, %v488_v37  ;;  %v868_v47 = vsel %vm861_vm3, %v851_v23, %v472_v41  ;;  %v860_v23 = vsel %vm844_vm2, %v843_v20, %v426_v4 }
 0x14f   : > { %v678_v33 = vpop.permute.xlu1 %677  ;;  %v662_v38 = vpop.permute.xlu0 %661 }
 0x150   : > { %v926_v35 = vsel %vm912_vm6, %v909_v55, %v678_v33  ;;  %v918_v36 = vsel %vm912_vm6, %v901_v56, %v662_v38 }
 0x153   : > { %v740_v51 = vpop.permute.xlu1 %739  ;;  %v724_v52 = vpop.permute.xlu0 %723 }
 0x154   : > { %v942_v43 = vsel %vm929_vm7, %v925_v25, %v740_v51  ;;  %v934_v44 = vsel %vm929_vm7, %v917_v28, %v724_v52  ;;  %v1367_v25 = vld [vmem:[%s2368_s2] ss:$0 sm:$0xff] }
 0x157   : > { %v490_v39 = vpop.permute.xlu1 %489  ;;  %v474_v40 = vpop.permute.xlu0 %473 }
 0x158   : > { %v877_v37 = vsel %vm861_vm3, %v860_v23, %v490_v39  ;;  %v869_v2 = vsel %vm861_vm3, %v852_v9, %v474_v40 }
 0x15b   : > { %v552_v59 = vpop.permute.xlu1 %551  ;;  %v536_v63 = vpop.permute.xlu0 %535 }
 0x15c   : > { %v893_v48 = vsel %vm878_vm4, %v876_v16, %v552_v59  ;;  %v885_v19 = vsel %vm878_vm4, %v868_v47, %v536_v63 }
 0x15f   : > { %v742_v46 = vpop.permute.xlu1 %741  ;;  %v726_v7 = vpop.permute.xlu0 %725 }
 0x160   : > { %v943_v0 = vsel %vm929_vm7, %v926_v35, %v742_v46  ;;  %v935_v45 = vsel %vm929_vm7, %v918_v36, %v726_v7 }
 0x163   : > { %v804_v49 = vpop.permute.xlu1 %803  ;;  %v788_v8 = vpop.permute.xlu0 %787 }
 0x164   : > { %v959_v62 = vsel %vm946_vm8, %v942_v43, %v804_v49  ;;  %v951_v50 = vsel %vm946_vm8, %v934_v44, %v788_v8 }
 0x165   : > { %1428 = vmatprep.mubr.msk.f32.mxu0 %vm975_vm9, %v951_v50  ;;  %1440 = vmatprep.mubr.msk.f32.mxu1 %vm975_vm9, %v959_v62 }
 0x167   : > { %v554_v17 = vpop.permute.xlu1 %553  ;;  %v538_v18 = vpop.permute.xlu0 %537 }
 0x168   : > { %v894_v33 = vsel %vm878_vm4, %v877_v37, %v554_v17  ;;  %v886_v4 = vsel %vm878_vm4, %v869_v2, %v538_v18 }
 0x16b   : > { %v616_v1 = vpop.permute.xlu1 %615  ;;  %v600_v5 = vpop.permute.xlu0 %599 }
 0x16c   : > { %v910_v24 = vsel %vm895_vm5, %v893_v48, %v616_v1  ;;  %v902_v61 = vsel %vm895_vm5, %v885_v19, %v600_v5 }
 0x16f   : > { %v806_v21 = vpop.permute.xlu1 %805  ;;  %v790_v22 = vpop.permute.xlu0 %789 }
 0x170   : > { %v960_v31 = vsel %vm946_vm8, %v943_v0, %v806_v21  ;;  %v952_v53 = vsel %vm946_vm8, %v935_v45, %v790_v22 }
 0x171   : > { %1429 = vmatmul.mubr.msk.f32.gmra.mrb[4].mxu0 %vm975_vm9, %v952_v53  ;;  %1441 = vmatmul.mubr.msk.f32.gmra.mrb[4].mxu1 %vm975_vm9, %v960_v31 }
 0x173   : > { %v618_v13 = vpop.permute.xlu1 %617  ;;  %v602_v14 = vpop.permute.xlu0 %601 }
 0x174   : > { %v911_v51 = vsel %vm895_vm5, %v894_v33, %v618_v13  ;;  %v903_v52 = vsel %vm895_vm5, %v886_v4, %v602_v14 }
 0x177   : > { %v680_v34 = vpop.permute.xlu1 %679  ;;  %v664_v54 = vpop.permute.xlu0 %663 }
 0x178   : > { %v927_v10 = vsel %vm912_vm6, %v910_v24, %v680_v34  ;;  %v919_v42 = vsel %vm912_vm6, %v902_v61, %v664_v54 }
 0x17b   : > { %v682_v58 = vpop.permute.xlu1 %681  ;;  %v666_v30 = vpop.permute.xlu0 %665 }
 0x17c   : > { %v928_v39 = vsel %vm912_vm6, %v911_v51, %v682_v58  ;;  %v920_v40 = vsel %vm912_vm6, %v903_v52, %v666_v30 }
 0x17f   : > { %v744_v26 = vpop.permute.xlu1 %743  ;;  %v728_v15 = vpop.permute.xlu0 %727 }
 0x180   : > { %v944_v6 = vsel %vm929_vm7, %v927_v10, %v744_v26  ;;  %v936_v3 = vsel %vm929_vm7, %v919_v42, %v728_v15 }
 0x183   : > { %v746_v29 = vpop.permute.xlu1 %745  ;;  %v730_v57 = vpop.permute.xlu0 %729 }
 0x184   : > { %v945_v59 = vsel %vm929_vm7, %v928_v39, %v746_v29  ;;  %v937_v63 = vsel %vm929_vm7, %v920_v40, %v730_v57 }
 0x187   : > { %v808_v60 = vpop.permute.xlu1 %807  ;;  %v792_v41 = vpop.permute.xlu0 %791 }
 0x188   : > { %v961_v32 = vsel %vm946_vm8, %v944_v6, %v808_v60  ;;  %v953_v38 = vsel %vm946_vm8, %v936_v3, %v792_v41 }
 0x189   : > { %1431 = vmatprep.mubr.msk.f32.mxu0 %vm975_vm9, %v953_v38  ;;  %1443 = vmatprep.mubr.msk.f32.mxu1 %vm975_vm9, %v961_v32 }
 0x18b   : > { %v810_v46 = vpop.permute.xlu1 %809  ;;  %v794_v7 = vpop.permute.xlu0 %793 }
 0x18c   : > { %v962_v11 = vsel %vm946_vm8, %v945_v59, %v810_v46  ;;  %v954_v12 = vsel %vm946_vm8, %v937_v63, %v794_v7 }
 0x18d   : > { %1432 = vmatmul.mubr.msk.f32.gmra.mrb[6].mxu0 %vm975_vm9, %v954_v12  ;;  %1444 = vmatmul.mubr.msk.f32.gmra.mrb[6].mxu1 %vm975_vm9, %v962_v11 }
 0x1c9   : > { %v1424_v28 = vpop.f32.mrb[0].mxu0  ;;  %v1436_v43 = vpop.f32.mrb[0].mxu1 }
 0x1ca   : > { %v1100_v44 = vadd.f32 %v1424_v28, %v1367_v25  ;;  %v1140_v49 = vadd.f32 %v1436_v43, %v1367_v25  ;;  %v1094_v8 = vpop.f32.mrb[1].mxu0  ;;  %v1134_v62 = vpop.f32.mrb[1].mxu1 }
 0x1cb   : > { %v1095_v50 = vadd.f32 %v1367_v25, %v1094_v8  ;;  %v1135_v17 = vadd.f32 %v1367_v25, %v1134_v62 }
 0x1cc   : > { %1174 = vst [vmem:[%s2295_s6 + $0x8] sm:$0xff] %v1100_v44  ;;  %1182 = vst [vmem:[%s2295_s6 + $0x48] sm:$0xff] %v1140_v49 }
 0x1cd   : > { %1173 = vst [vmem:[%s2295_s6] sm:$0xff] %v1095_v50  ;;  %1181 = vst [vmem:[%s2295_s6 + $0x40] sm:$0xff] %v1135_v17 }
 0x208   : > { %v1427_v18 = vpop.f32.mrb[2].mxu0  ;;  %v1439_v1 = vpop.f32.mrb[2].mxu1 }
 0x209   : > { %v1110_v5 = vadd.f32 %v1427_v18, %v1367_v25  ;;  %v1150_v55 = vadd.f32 %v1439_v1, %v1367_v25  ;;  %v1104_v56 = vpop.f32.mrb[3].mxu0  ;;  %v1144_v35 = vpop.f32.mrb[3].mxu1 }
 0x20a   : > { %v1105_v36 = vadd.f32 %v1367_v25, %v1104_v56  ;;  %v1145_v0 = vadd.f32 %v1367_v25, %v1144_v35 }
 0x20b   : > { %1176 = vst [vmem:[%s2295_s6 + $0x18] sm:$0xff] %v1110_v5  ;;  %1184 = vst [vmem:[%s2295_s6 + $0x58] sm:$0xff] %v1150_v55 }
 0x20c   : > { %1175 = vst [vmem:[%s2295_s6 + $0x10] sm:$0xff] %v1105_v36  ;;  %1183 = vst [vmem:[%s2295_s6 + $0x50] sm:$0xff] %v1145_v0 }
 0x244   : > { %v1430_v45 = vpop.f32.mrb[4].mxu0  ;;  %v1442_v21 = vpop.f32.mrb[4].mxu1 }
 0x245   : > { %v1120_v22 = vadd.f32 %v1430_v45, %v1367_v25  ;;  %v1160_v31 = vadd.f32 %v1442_v21, %v1367_v25  ;;  %v1114_v53 = vpop.f32.mrb[5].mxu0  ;;  %v1154_v13 = vpop.f32.mrb[5].mxu1 }
 0x246   : > { %v1115_v14 = vadd.f32 %v1367_v25, %v1114_v53  ;;  %v1155_v34 = vadd.f32 %v1367_v25, %v1154_v13 }
 0x247   : > { %1178 = vst [vmem:[%s2295_s6 + $0x28] sm:$0xff] %v1120_v22  ;;  %1186 = vst [vmem:[%s2295_s6 + $0x68] sm:$0xff] %v1160_v31 }
 0x248   : > { %1177 = vst [vmem:[%s2295_s6 + $0x20] sm:$0xff] %v1115_v14  ;;  %1185 = vst [vmem:[%s2295_s6 + $0x60] sm:$0xff] %v1155_v34 }
 0x260   : > { %v1433_v54 = vpop.f32.mrb[6].mxu0  ;;  %v1445_v58 = vpop.f32.mrb[6].mxu1 }
 0x261   : > { %v1130_v30 = vadd.f32 %v1433_v54, %v1367_v25  ;;  %v1170_v26 = vadd.f32 %v1445_v58, %v1367_v25  ;;  %v1124_v15 = vpop.f32.mrb[7].mxu0  ;;  %v1164_v16 = vpop.f32.mrb[7].mxu1 }
 0x262   : > { %v1125_v47 = vadd.f32 %v1367_v25, %v1124_v15  ;;  %v1165_v29 = vadd.f32 %v1367_v25, %v1164_v16 }
 0x263   : > { %1180 = vst [vmem:[%s2295_s6 + $0x38] sm:$0xff] %v1130_v30  ;;  %1188 = vst [vmem:[%s2295_s6 + $0x78] sm:$0xff] %v1170_v26 }
 0x264   : > { %1179 = vst [vmem:[%s2295_s6 + $0x30] sm:$0xff] %v1125_v47  ;;  %1187 = vst [vmem:[%s2295_s6 + $0x70] sm:$0xff] %v1165_v29 }
 0x265   : > { %1522 = shalt.err (!%p1519_p3)
}
 0x266   : > { %s1523_s26 = scalar_lea.hbm %s2314_s17, 2048  ;;  %s1527_s28 = scalar_lea.hbm %s2369_s3, 4096 }
 0x267   : > { %p1524_p4 = scmp.ne.s32.totalorder %s2314_s17, %s1523_s26  ;;  %p1528_p9 = scmp.lt.u32.totalorder %s2314_s17, %s2369_s3 }
 0x268   : > { %p1529_p10 = scmp.lt.u32.totalorder %s1527_s28, %s1523_s26  ;;  %p1531_p12 = scmp.lt.u32.totalorder %s1523_s26, %s2314_s17 }
 0x269   : > { %p1525_p7 = pnand %p1524_p4, %p1641_p5 }
 0x26a   : > { %p1530_p11 = por %p1529_p10, %p1528_p9 }
 0x26b   : > { %p1526_p8 = pneg %p1525_p7 }
 0x26c   : > { %p1532_p13 = por %p1531_p12, %p1530_p11 }
 0x26e   : > { %p1533_p0 = pnand %p1532_p13, %p1526_p8 }
 0x270   : > { %1536 = shalt.err (!%p1533_p0)
}
 0x271   : > { %s1582_s5 = smov 128  }
 0x272   : > { %1461 = dma.vmem_to_hbm [thread:$0]  (%p1641_p5), %s2316_s8, 2048, %s2314_s17, %s2324_s16, %s1582_s5, %s1582_s5, %s1574_s30  }
 0x273 PF: > { %p1467_p1 = scmp.ge.s32.totalorder %s1571_s15, 2  ;;  %s1218_s6 = sand.u32 1, %s1559_s12  }
 0x274   : > { %s1219_s7 = scalar_lea.sflag [#allocation3], %s1218_s6 }
 0x275   : > { %p1464_p2 = pnand %p1467_p1, %p1645_p6 }
 0x277   : > { %1554 = dma.done.wait (!%p1464_p2), %s1219_s7, 2048  }
 0x278   : > { %1556 = vsyncadd (!%p1464_p2), %s1219_s7, 4294965248  ;;  %p13_p3 = scmp.ge.s32.totalorder %s1628_s18, 4   ;;  %s2390_s12 = smov %s1563_s13 }
 0x279   : > { %s2391_s13 = smov %s1567_s14  ;;  %s2392_s14 = smov %s1639_s21 }
 0x27a   : > { %s2393_s15 = smov %s1628_s18  ;;  %15 = sbr.rel (!%p13_p3) target bundleno = 3 (0x3), region = 69 }
 0x281   :  { %1224 = vsyncpa [#allocation3], 1 }
 0x282   :  { %1226 = vsyncpa [#allocation3 + $0x1], 1 }

</bundles_post_ra>
